<compile_context>
chip_gen: v7x
topology: tpu7x:2x2x1
jax: 0.10.0
libtpu: 0.0.40
codegen_flags: <defaults>
</compile_context>

<pallas_src>
import functools
import math

import jax
import jax.numpy as jnp
from jax.experimental import pallas as pl
from jax.experimental.pallas import tpu as pltpu


# ---------------------------------------------------------------------------
# Pallas kernels
# ---------------------------------------------------------------------------

def _matmul_bias_act_kernel(w_ref, x_ref, b_ref, o_ref, acc_ref, *, activation):
    """One (n, s_tile, k_tile) grid step of O[n] = act(W @ X[n] + bias).

    w_ref:   (Co, tk)  weights (resident: index map ignores n and s)
    x_ref:   (tk, ts)  data (contraction on sublanes, spatial on lanes)
    b_ref:   (Co, 1)   bias column (resident)
    o_ref:   (Co, ts)  lane-dense output tile
    acc_ref: (Co, ts)  f32 accumulator scratch
    """
    k = pl.program_id(2)

    @pl.when(k == 0)
    def _():
        acc_ref[...] = jnp.zeros_like(acc_ref)

    acc_ref[...] += jnp.dot(w_ref[...], x_ref[...],
                            preferred_element_type=jnp.float32)

    @pl.when(k == pl.num_programs(2) - 1)
    def _():
        y = acc_ref[...] + b_ref[...]
        if activation == "relu":
            y = jnp.maximum(y, 0.0)
        elif activation == "leaky":
            y = jnp.where(y >= 0, y, 0.2 * y)
        o_ref[...] = y.astype(o_ref.dtype)


def _bn_leaky_kernel(x_ref, g_ref, b_ref, o_ref, *, eps, slope, inv_count):
    """Training-mode BatchNorm (per-channel batch stats over (N, spatial)) fused
    with LeakyReLU.  x_ref: (N, C, S); g_ref/b_ref: (1, C, 1)."""
    x = x_ref[...]
    s1 = jnp.sum(x, axis=2, keepdims=True)       # lane reduce   -> (N, C, 1)
    s1 = jnp.sum(s1, axis=0, keepdims=True)      # batch reduce  -> (1, C, 1)
    mean = s1 * inv_count
    d = x - mean
    s2 = jnp.sum(d * d, axis=2, keepdims=True)
    s2 = jnp.sum(s2, axis=0, keepdims=True)
    var = s2 * inv_count                         # biased variance (BN training)
    y = d * jax.lax.rsqrt(var + eps) * g_ref[...] + b_ref[...]
    o_ref[...] = jnp.where(y >= 0, y, slope * y).astype(o_ref.dtype)


def _reparam_kernel(mu_ref, logvar_ref, eps_ref, z_ref):
    z_ref[...] = mu_ref[...] + eps_ref[...] * jnp.exp(0.5 * logvar_ref[...])


# ---------------------------------------------------------------------------
# Pallas wrappers
# ---------------------------------------------------------------------------

def _pick_tile(dim, max_tile, quantum):
    """Largest tile: full extent if it fits, else the biggest quantum-multiple
    divisor <= max_tile."""
    if dim <= max_tile or dim % quantum != 0:
        return dim
    t = (max_tile // quantum) * quantum
    while dim % t:
        t -= quantum
    return t


def matmul_bias_act(w, x, bias, *, activation="none", max_ts=2048, max_tk=2048):
    """Batched O[n] = act(W @ X[n] + bias) on the MXU.

    w: (Co, K)    x: (G, K, S)    bias: (Co,)    ->   (G, Co, S)
    """
    G, K, S = x.shape
    Co = w.shape[0]
    ts = _pick_tile(S, max_ts, 128)
    tk = _pick_tile(K, max_tk, 128)
    grid = (G, S // ts, K // tk)

    kernel = functools.partial(_matmul_bias_act_kernel, activation=activation)
    return pl.pallas_call(
        kernel,
        out_shape=jax.ShapeDtypeStruct((G, Co, S), x.dtype),
        grid_spec=pltpu.PrefetchScalarGridSpec(
            num_scalar_prefetch=0,
            grid=grid,
            in_specs=[
                pl.BlockSpec((Co, tk), lambda n, s, k: (0, k)),
                pl.BlockSpec((None, tk, ts), lambda n, s, k: (n, k, s)),
                pl.BlockSpec((Co, 1), lambda n, s, k: (0, 0)),
            ],
            out_specs=pl.BlockSpec((None, Co, ts), lambda n, s, k: (n, 0, s)),
            scratch_shapes=[pltpu.VMEM((Co, ts), jnp.float32)],
        ),
        compiler_params=pltpu.CompilerParams(
            dimension_semantics=("parallel", "parallel", "arbitrary"),
            vmem_limit_bytes=32 * 1024 * 1024,
        ),
    )(w, x, bias.reshape(Co, 1))


def batchnorm_leaky(x, gamma, beta, *, eps, slope=0.2):
    """x: (N, C, S) -> LeakyReLU(BatchNorm_train(x)) with batch statistics."""
    N, C, S = x.shape
    kernel = functools.partial(_bn_leaky_kernel, eps=eps, slope=slope,
                               inv_count=1.0 / float(N * S))
    # Whole tensor as a single VMEM block (tiny at demo scale).
    # TODO(synk): for large N*S tile over S with a two-phase stats pass.
    return pl.pallas_call(
        kernel, out_shape=jax.ShapeDtypeStruct(x.shape, x.dtype),
    )(x, gamma.reshape(1, C, 1), beta.reshape(1, C, 1))


def reparametrize(mu, logvar, eps):
    return pl.pallas_call(
        _reparam_kernel, out_shape=jax.ShapeDtypeStruct(mu.shape, mu.dtype),
    )(mu, logvar, eps)


def linear(x, w, b, *, activation="none"):
    """y = act(x @ w.T + b) via the same GEMM kernel (x: (B, K), w: (Nout, K))."""
    bsz, k = x.shape
    y = matmul_bias_act(w, x.T.reshape(1, k, bsz), b, activation=activation)
    return y[0].T


# ---------------------------------------------------------------------------
# JAX-side index arithmetic feeding the Pallas GEMM
# TODO(synk): im2col / bilinear-resize / replication-pad are data-movement only;
# a fused DMA-gather kernel would remove the wrapper-side HBM passes at scale.
# ---------------------------------------------------------------------------

def _im2col_3d(x, k, stride, pad):
    N, C, D, H, W = x.shape
    xp = jnp.pad(x, ((0, 0), (0, 0), (pad, pad), (pad, pad), (pad, pad)))
    od = (D + 2 * pad - k) // stride + 1
    oh = (H + 2 * pad - k) // stride + 1
    ow = (W + 2 * pad - k) // stride + 1
    cols = []
    for kd in range(k):
        for kh in range(k):
            for kw in range(k):
                cols.append(xp[:, :, kd:kd + stride * od:stride,
                                     kh:kh + stride * oh:stride,
                                     kw:kw + stride * ow:stride])
    p = jnp.stack(cols, axis=2)                       # (N, C, k^3, od, oh, ow)
    return p.reshape(N, C * k ** 3, od * oh * ow), (od, oh, ow)


def _im2col_2d(xp, k):
    N, C, Hp, Wp = xp.shape
    oh, ow = Hp - k + 1, Wp - k + 1
    cols = []
    for kh in range(k):
        for kw in range(k):
            cols.append(xp[:, :, kh:kh + oh, kw:kw + ow])
    p = jnp.stack(cols, axis=2)                       # (N, C, k^2, oh, ow)
    return p.reshape(N, C * k * k, oh * ow), (oh, ow)


def _upsample2x_bilinear_align_corners(x):
    """nn.Upsample(scale_factor=2, mode='bilinear', align_corners=True)."""
    _, _, h_, w_ = x.shape

    def interp_matrix(n_in):
        n_out = 2 * n_in
        if n_in == 1:
            return jnp.ones((n_out, 1), jnp.float32)
        pos = jnp.arange(n_out, dtype=jnp.float32) * (n_in - 1) / (n_out - 1)
        lo = jnp.clip(jnp.floor(pos).astype(jnp.int32), 0, n_in - 2)
        frac = pos - lo.astype(jnp.float32)
        rows = jnp.arange(n_out)
        m = jnp.zeros((n_out, n_in), jnp.float32)
        m = m.at[rows, lo].set(1.0 - frac)
        m = m.at[rows, lo + 1].add(frac)
        return m

    uh, uw = interp_matrix(h_), interp_matrix(w_)
    y = jnp.einsum("oh,nchw->ncow", uh, x, precision=jax.lax.Precision.HIGHEST)
    y = jnp.einsum("pw,ncow->ncop", uw, y, precision=jax.lax.Precision.HIGHEST)
    return y


# ---------------------------------------------------------------------------
# Module blocks
# ---------------------------------------------------------------------------

def encoder3d_block(x, w, b, gamma, beta, *, eps=1e-5):
    """Encoder3D: Conv3d(k=4, s=2, p=1) + BatchNorm3d + LeakyReLU(0.2)."""
    co = w.shape[0]
    p, (od, oh, ow) = _im2col_3d(x, 4, 2, 1)
    y = matmul_bias_act(w.reshape(co, -1), p, b, activation="none")
    y = batchnorm_leaky(y, gamma, beta, eps=eps, slope=0.2)
    return y.reshape(x.shape[0], co, od, oh, ow)


def decoder2d_block(x, w, b, gamma, beta, *, eps=1e-3):
    """Decoder2D: Upsample(x2, bilinear, align_corners) + ReplicationPad2d(1) +
    Conv2d(k=3, s=1) + BatchNorm2d(eps=1e-3) + LeakyReLU(0.2)."""
    co = w.shape[0]
    up = _upsample2x_bilinear_align_corners(x)
    up = jnp.pad(up, ((0, 0), (0, 0), (1, 1), (1, 1)), mode="edge")
    p, (oh, ow) = _im2col_2d(up, 3)
    y = matmul_bias_act(w.reshape(co, -1), p, b, activation="none")
    y = batchnorm_leaky(y, gamma, beta, eps=eps, slope=0.2)
    return y.reshape(x.shape[0], co, oh, ow)


# ---------------------------------------------------------------------------
# Demo / correctness check
# ---------------------------------------------------------------------------

if __name__ == "__main__":
    root = jax.random.PRNGKey(0)
    kit = iter(jax.random.split(root, 40))

    def u(shape, bound):
        return jax.random.uniform(next(kit), shape, jnp.float32, -bound, bound)

    # Small VAE3D config (module formulas with img_size=16, latent=64).
    N, in_ch, out_ch, img, latent = 2, 3, 3, 16, 64
    n_layers = int(math.log2(img)) - 1                       # 3
    s_min = img // 2 ** n_layers                              # 2
    fc_in = img * 2 ** (n_layers - 2) * s_min ** 3            # 256
    d1_out = 2 * img * 2 ** (n_layers - 2) * s_min ** 3       # 512
    dec_in = 2 * img * 2 ** (n_layers - 2)                    # 64
    dec_out = img * 2 ** (n_layers - 2)                       # 32

    x = jax.random.normal(next(kit), (N, in_ch, img, img, img), jnp.float32)

    # Encoder3D channel plan, exactly as in VAE3D.__init__.
    enc_io = [(in_ch, img)]
    for i in range(n_layers - 2):
        enc_io.append((img * 2 ** i, 2 * img * 2 ** i))
    enc_io.append((img * 2 ** (n_layers - 2), img * 2 ** (n_layers - 2)))

    enc_params = []
    for ci, co in enc_io:
        bound = 1.0 / math.sqrt(ci * 4 ** 3)
        enc_params.append(dict(w=u((co, ci, 4, 4, 4), bound), b=u((co,), bound),
                               gamma=u((co,), 0.5) + 1.0, beta=u((co,), 0.5)))

    fcb = 1.0 / math.sqrt(fc_in)
    fc1_w, fc1_b = u((latent, fc_in), fcb), u((latent,), fcb)
    fc2_w, fc2_b = u((latent, fc_in), fcb), u((latent,), fcb)
    d1b = 1.0 / math.sqrt(latent)
    d1_w, d1_b = u((d1_out, latent), d1b), u((d1_out,), d1b)
    decb = 1.0 / math.sqrt(dec_in * 9)
    dec_w, dec_b = u((dec_out, dec_in, 3, 3), decb), u((dec_out,), decb)
    dec_g, dec_be = u((dec_out,), 0.5) + 1.0, u((dec_out,), 0.5)
    eps_noise = jax.random.normal(next(kit), (N, latent), jnp.float32)

    # ----------------- Pallas forward: encode -> reparametrize -> d1 ---------
    h = x
    for p in enc_params:
        h = encoder3d_block(h, p["w"], p["b"], p["gamma"], p["beta"], eps=1e-5)
    h_flat = h.reshape(N, fc_in)
    mu = linear(h_flat, fc1_w, fc1_b)
    logvar = linear(h_flat, fc2_w, fc2_b)
    z = reparametrize(mu, logvar, eps_noise)
    hd = linear(z, d1_w, d1_b, activation="relu")
    h5 = hd.reshape(N, dec_in, s_min, s_min, s_min)

    # TODO(synk): the reference decode() feeds this 5-D tensor into 2-D
    # Decoder2D blocks and a final Linear over out_channels*img_size**3
    # features; that chain is shape-inconsistent in the original module, so
    # only the Decoder2D building block is exercised here (depth folded into
    # batch), and the final_activation Linear is omitted.
    h4 = jnp.transpose(h5, (0, 2, 1, 3, 4)).reshape(N * s_min, dec_in, s_min, s_min)
    dec_y = decoder2d_block(h4, dec_w, dec_b, dec_g, dec_be, eps=1e-3)

    jax.block_until_ready((h, mu, logvar, z, dec_y))

    # ----------------- Pure-JAX reference ------------------------------------
    HI = jax.lax.Precision.HIGHEST

    def ref_enc_block(xx, w, b, g, be, eps):
        y = jax.lax.conv_general_dilated(
            xx, w, (2, 2, 2), [(1, 1)] * 3,
            dimension_numbers=("NCDHW", "OIDHW", "NCDHW"), precision=HI)
        y = y + b.reshape(1, -1, 1, 1, 1)
        m = jnp.mean(y, axis=(0, 2, 3, 4), keepdims=True)
        v = jnp.mean(jnp.square(y - m), axis=(0, 2, 3, 4), keepdims=True)
        y = ((y - m) * jax.lax.rsqrt(v + eps) * g.reshape(1, -1, 1, 1, 1)
             + be.reshape(1, -1, 1, 1, 1))
        return jnp.where(y >= 0, y, 0.2 * y)

    def ref_linear(xx, w, b):
        return jnp.dot(xx, w.T, precision=HI) + b

    hr = x
    for p in enc_params:
        hr = ref_enc_block(hr, p["w"], p["b"], p["gamma"], p["beta"], 1e-5)
    hr_flat = hr.reshape(N, fc_in)
    mu_r = ref_linear(hr_flat, fc1_w, fc1_b)
    logvar_r = ref_linear(hr_flat, fc2_w, fc2_b)
    z_r = mu_r + eps_noise * jnp.exp(0.5 * logvar_r)
    hd_r = jnp.maximum(ref_linear(z_r, d1_w, d1_b), 0.0)
    h4_r = jnp.transpose(hd_r.reshape(N, dec_in, s_min, s_min, s_min),
                         (0, 2, 1, 3, 4)).reshape(N * s_min, dec_in, s_min, s_min)
    u_r = _upsample2x_bilinear_align_corners(h4_r)
    u_r = jnp.pad(u_r, ((0, 0), (0, 0), (1, 1), (1, 1)), mode="edge")
    y_r = jax.lax.conv_general_dilated(
        u_r, dec_w, (1, 1), [(0, 0), (0, 0)],
        dimension_numbers=("NCHW", "OIHW", "NCHW"), precision=HI)
    y_r = y_r + dec_b.reshape(1, -1, 1, 1)
    m = jnp.mean(y_r, axis=(0, 2, 3), keepdims=True)
    v = jnp.mean(jnp.square(y_r - m), axis=(0, 2, 3), keepdims=True)
    y_r = ((y_r - m) * jax.lax.rsqrt(v + 1e-3) * dec_g.reshape(1, -1, 1, 1)
           + dec_be.reshape(1, -1, 1, 1))
    dec_r = jnp.where(y_r >= 0, y_r, 0.2 * y_r)

    # ----------------- Checks -------------------------------------------------
    def _check(name, got, want, tol=1e-2):
        err = jnp.max(jnp.abs(got - want)) / (jnp.max(jnp.abs(want)) + 1e-6)
        assert got.shape == want.shape, f"{name}: shape {got.shape} vs {want.shape}"
        assert float(err) < tol, f"{name}: rel err {float(err):.3e}"

    _check("encoder_stack", h, hr)
    _check("mu", mu, mu_r)
    _check("logvar", logvar, logvar_r)
    _check("z", z, z_r)
    _check("decoder2d_block", dec_y, dec_r)

    print("KERNEL_OK")
</pallas_src>

<mosaic_0001>
module attributes {stable_mosaic.version = 11 : i64} {
  func.func @_matmul_bias_act_kernel(%arg0: i32, %arg1: i32, %arg2: i32, %arg3: memref<16x192xf32, #tpu.memory_space<vmem>>, %arg4: memref<1x192x512xf32, #tpu.memory_space<vmem>>, %arg5: memref<16x1xf32, #tpu.memory_space<vmem>>, %arg6: memref<1x16x512xf32, #tpu.memory_space<vmem>>, %arg7: memref<16x512xf32, #tpu.memory_space<vmem>>) attributes {dimension_semantics = [#tpu.dimension_semantics<parallel>, #tpu.dimension_semantics<parallel>, #tpu.dimension_semantics<arbitrary>], iteration_bounds = array<i64: 2, 1, 1>, scalar_prefetch = 0 : i64, scratch_operands = 1 : i64, tpu.core_type = #tpu.core_type<tc>, window_params = [{transform_indices = @transform_0, window_bounds = array<i64: 16, 192>}, {transform_indices = @transform_1, window_bounds = array<i64: 1, 192, 512>}, {pipeline_mode = #tpu.pipeline_mode<synchronous>, transform_indices = @transform_2, window_bounds = array<i64: 16, 1>}, {transform_indices = @transform_3, window_bounds = array<i64: 1, 16, 512>}]} {
    %c0_i32 = arith.constant 0 : i32
    %0 = arith.cmpi eq, %arg2, %c0_i32 : i32
    %1 = arith.extui %0 : i1 to i32
    %c0_i32_0 = arith.constant 0 : i32
    %2 = arith.cmpi ne, %1, %c0_i32_0 : i32
    scf.if %2 {
      %cst_11 = arith.constant 0.000000e+00 : f32
      %13 = vector.broadcast %cst_11 : f32 to vector<16x512xf32>
      %c0_12 = arith.constant 0 : index
      %c0_13 = arith.constant 0 : index
      %14 = vector.load %arg7[%c0_12, %c0_13] : memref<16x512xf32, #tpu.memory_space<vmem>>, vector<16x512xf32>
      tpu.vector_store %arg7[%c0_12, %c0_13], %13 {strides = array<i32>} : memref<16x512xf32, #tpu.memory_space<vmem>>, vector<16x512xf32>,
    } else {
    }
    %c0 = arith.constant 0 : index
    %c0_1 = arith.constant 0 : index
    %3 = vector.load %arg7[%c0, %c0_1] : memref<16x512xf32, #tpu.memory_space<vmem>>, vector<16x512xf32>
    %c0_2 = arith.constant 0 : index
    %c0_3 = arith.constant 0 : index
    %4 = vector.load %arg3[%c0_2, %c0_3] : memref<16x192xf32, #tpu.memory_space<vmem>>, vector<16x192xf32>
    %c0_4 = arith.constant 0 : index
    %c0_5 = arith.constant 0 : index
    %c0_6 = arith.constant 0 : index
    %5 = vector.load %arg4[%c0_4, %c0_5, %c0_6] : memref<1x192x512xf32, #tpu.memory_space<vmem>>, vector<1x192x512xf32>
    %6 = vector.shape_cast %5 : vector<1x192x512xf32> to vector<192x512xf32>
    %cst = arith.constant dense<0.000000e+00> : vector<16x512xf32>
    %7 = tpu.matmul %4, %6, %cst {dimension_numbers = #tpu.dot_dimension_numbers<[1], [0], [0], [1], [0, 0, 1, 1], [], []>} : vector<16x192xf32>, vector<192x512xf32>, vector<16x512xf32> -> vector<16x512xf32>
    %8 = arith.addf %3, %7 : vector<16x512xf32>
    %c0_7 = arith.constant 0 : index
    %c0_8 = arith.constant 0 : index
    %9 = vector.load %arg7[%c0_7, %c0_8] : memref<16x512xf32, #tpu.memory_space<vmem>>, vector<16x512xf32>
    tpu.vector_store %arg7[%c0_7, %c0_8], %8 {strides = array<i32>} : memref<16x512xf32, #tpu.memory_space<vmem>>, vector<16x512xf32>,
    %c0_i32_9 = arith.constant 0 : i32
    %10 = arith.cmpi eq, %arg2, %c0_i32_9 : i32
    %11 = arith.extui %10 : i1 to i32
    %c0_i32_10 = arith.constant 0 : i32
    %12 = arith.cmpi ne, %11, %c0_i32_10 : i32
    scf.if %12 {
      %c0_11 = arith.constant 0 : index
      %c0_12 = arith.constant 0 : index
      %13 = vector.load %arg7[%c0_11, %c0_12] : memref<16x512xf32, #tpu.memory_space<vmem>>, vector<16x512xf32>
      %c0_13 = arith.constant 0 : index
      %c0_14 = arith.constant 0 : index
      %14 = vector.load %arg5[%c0_13, %c0_14] : memref<16x1xf32, #tpu.memory_space<vmem>>, vector<16x1xf32>
      %15 = vector.broadcast %14 : vector<16x1xf32> to vector<16x512xf32>
      %16 = arith.addf %13, %15 : vector<16x512xf32>
      %c0_15 = arith.constant 0 : index
      %c0_16 = arith.constant 0 : index
      %c0_17 = arith.constant 0 : index
      %17 = vector.load %arg6[%c0_15, %c0_16, %c0_17] : memref<1x16x512xf32, #tpu.memory_space<vmem>>, vector<1x16x512xf32>
      %18 = vector.shape_cast %17 : vector<1x16x512xf32> to vector<16x512xf32>
      %19 = vector.shape_cast %16 : vector<16x512xf32> to vector<1x16x512xf32>
      tpu.vector_store %arg6[%c0_15, %c0_16, %c0_17], %19 {strides = array<i32>} : memref<1x16x512xf32, #tpu.memory_space<vmem>>, vector<1x16x512xf32>,
    } else {
    }
    return
  }
  func.func @transform_0(%arg0: i32, %arg1: i32, %arg2: i32) -> (i32, i32) {
    %c0_i32 = arith.constant 0 : i32
    %c0_i32_0 = arith.constant 0 : i32
    return %c0_i32, %arg2 : i32, i32
  }
  func.func @transform_1(%arg0: i32, %arg1: i32, %arg2: i32) -> (i32, i32, i32) {
    %c0_i32 = arith.constant 0 : i32
    return %arg0, %arg2, %arg1 : i32, i32, i32
  }
  func.func @transform_2(%arg0: i32, %arg1: i32, %arg2: i32) -> (i32, i32) {
    %c0_i32 = arith.constant 0 : i32
    %c0_i32_0 = arith.constant 0 : i32
    %c0_i32_1 = arith.constant 0 : i32
    return %c0_i32, %c0_i32_0 : i32, i32
  }
  func.func @transform_3(%arg0: i32, %arg1: i32, %arg2: i32) -> (i32, i32, i32) {
    %c0_i32 = arith.constant 0 : i32
    %c0_i32_0 = arith.constant 0 : i32
    return %arg0, %c0_i32, %arg1 : i32, i32, i32
  }
}

</mosaic_0001>

<bundles_post_ra>
// kernel: tpu_custom_call.1
= control target key start
LH: loop header
LB: loop body
LE: loop exit
PB: predicated region body
PF: predicated region fallthrough
CT: control target
= control target key end

     0   :  { %8 = vsyncpa [#allocation4], 0  ;;  %s1401_s0 = inlined_call_operand.hbm [shape: f32[16,192], index: 0, kind: input, shape index: {}]   ;;  %s1402_s1 = inlined_call_operand.hbm [shape: f32[2,192,512], index: 1, kind: input, shape index: {}]   ;;  %s1403_s2 = inlined_call_operand.vmem [shape: f32[16,1], index: 2, kind: input, shape index: {}]   ;;  %s1404_s3 = inlined_call_operand.hbm [shape: f32[2,16,512], index: 3, kind: output, shape index: {}]  }
   0x1   :  { %9 = vsyncpa [#allocation7], 0 }
   0x2   :  { %11 = vsyncpa [#allocation7 + $0x1], 0 }
   0x3   :  { %12 = vsyncpa [#allocation5], 0 }
   0x4   :  { %14 = vsyncpa [#allocation5 + $0x1], 0  ;;  %s1079_s12 = smov 0   ;;  %s1081_s13 = smov 0  }
   0x5   :  { %s1083_s14 = smov 0   ;;  %s1085_s15 = smov 0  }
   0x6   :  { %s1087_s16 = smov 0   ;;  %s1089_s17 = smov 0  }
   0x7 LB: > { %s704_s18 = sadd.s32 4294967295, %s1047_s17   ;;  %s705_s19 = sadd.s32 4294967294, %s1047_s17   ;;  %s1047_s17 = sphi %s1089_s17, %s20_s17   ;;  %s1043_s16 = sphi %s1087_s16, %s1427_s16   ;;  %s1039_s15 = sphi %s1085_s15, %s1426_s15   ;;  %s1035_s14 = sphi %s1083_s14, %s1425_s14   ;;  %s1031_s13 = sphi %s1081_s13, %s1424_s13   ;;  %s1027_s12 = sphi %s1079_s12, %s1423_s12  }
   0x8   : > { %p89_p0 = scmp.ne.s32.totalorder %s1031_s13, %s1027_s12  ;;  %p1113_p1 = scmp.eq.s32.totalorder %s704_s18, 0 }
   0x9   : > { %p1117_p2 = scmp.eq.s32.totalorder %s704_s18, 1  ;;  %p142_p3 = scmp.eq.s32.totalorder %s705_s19, 1 }
   0xa   : > { %s1409_s20 = scalar_select %p1113_p1, 1, 0 }
   0xb   : > { %s1410_s21 = scalar_select %p1117_p2, 1, 0 }
   0xc   : > { %p1123_p4 = por %p1113_p1, %p89_p0  ;;  %p706_p5 = scmp.ge.s32.totalorder %s1047_s17, 1 }
   0xd   : > { %p1128_p6 = por %p142_p3, %p89_p0  ;;  %p149_p7 = scmp.lt.s32.totalorder %s1047_s17, 3 }
   0xe   : > { %s1411_s22 = scalar_select %p1123_p4, 1, 0 }
   0xf   : > { %s1412_s23 = scalar_select %p1128_p6, 1, 0 }
  0x10   : > { %p1133_p8 = pnand %p706_p5, %p149_p7  ;;  %s1049_s25 = smov [#allocation3]  }
  0x11   : > { %s164_s26 = sshll.u32 %s1049_s25, 4  ;;  %s39_s28 = sadd.s32 1, %s1043_s16  ;;  %s165_s26 = int_to_ptr.vmem [resolvable:$true] %s164_s26 }
  0x12   : > { %s1413_s24 = scalar_select %p1133_p8, 1, 0 }
  0x13   : > { %p830_p9 = pneg %p1133_p8  ;;  %s903_s4 = scalar_lea.hbm %s1401_s0, 512 }
  0x14   : > { %p904_p12 = scmp.ne.s32.totalorder %s1401_s0, %s903_s4  ;;  %p910_p5 = scmp.lt.u32.totalorder %s903_s4, %s1401_s0 }
  0x15   : > { %p1142_p11 = pnand %p830_p9, %p1113_p1 }
  0x17   : > { %p905_p13 = pneg %p1142_p11 }
  0x19   : > { %p906_p0 = pnand %p905_p13, %p904_p12 }
  0x1b   : > { %p907_p3 = pneg %p906_p0 }
  0x1d   : > { %p912_p7 = pnand %p910_p5, %p907_p3 }
  0x1f   : > { %915 = shalt.err (!%p912_p7)
}
  0x20   : > { %s916_s9 = scalar_lea.vmem %s165_s26, 512  ;;  %p924_p4 = scmp.lt.s32.totalorder %s165_s26, %s165_s26 }
  0x21   : > { %p917_p9 = scmp.ne.s32.totalorder %s165_s26, %s916_s9  ;;  %p925_p1 = scmp.lt.s32.totalorder %s916_s9, %s916_s9 }
  0x23   : > { %p919_p10 = pnand %p917_p9, %p905_p13  ;;  %p926_p8 = por %p925_p1, %p924_p4 }
  0x25   : > { %p920_p6 = pneg %p919_p10 }
  0x27   : > { %p927_p2 = pnand %p926_p8, %p920_p6 }
  0x29   : > { %930 = shalt.err (!%p927_p2)
}
  0x2a   : > { %s1050_s10 = smov 256   ;;  %s1051_s11 = smov 16  }
  0x2b   : > { %833 = dma.hbm_to_vmem [thread:$0]  (!%p1142_p11), %s1401_s0, 512, %s165_s26, [#allocation4], %s1050_s10, %s1050_s10, %s1051_s11  }
  0x2c   : > { %p41_p1 = scmp.ge.s32.totalorder %s39_s28, 2  ;;  %s76_s25 = sadd.s32 1, %s1035_s14 }
  0x2d   : > { %p83_p2 = scmp.ne.s32.totalorder %s1035_s14, %s1031_s13  ;;  %p84_p4 = scmp.eq.s32.totalorder %s1047_s17, 0 }
  0x2e   : > { %s1429_s28 = smov (%p41_p1, %s39_s28), 0  ;;  %p1415_p8 = scmp.ne.s32.totalorder %s1410_s21, 0 }
  0x2f   : > { %p85_p6 = por %p84_p4, %p83_p2  ;;  %s69_s30 = ssub.s32 %s1043_s16, %s1429_s28 }
  0x30   : > { %p1171_p10 = por %p1415_p8, %p83_p2  ;;  %p843_p12 = scmp.lt.s32.totalorder %s1047_s17, 2 }
  0x31   : > { %p74_p13 = scmp.eq.s32.totalorder %s69_s30, 0  ;;  %s181_s27 = sand.u32 1, %s1035_s14  }
  0x32   : > { %s819_s4 = smul.u32 768, %s181_s27  ;;  %p1183_p11 = pnand %p843_p12, %p85_p6 }
  0x33   : > { %s1180_s5 = scalar_select %p74_p13, %s1035_s14, %s76_s25  }
  0x34   : > { %s820_s26 = smul.u32 12288, %s1043_s16  ;;  %s185_s6 = scalar_lea.vmem [#allocation6], %s819_s4 }
  0x35   : > { %s197_s7 = sshll.u32 %s185_s6, 4  ;;  %s1194_s11 = scalar_lea.sflag [#allocation7], %s181_s27  ;;  %s1192_s7 = int_to_ptr.vmem [resolvable:$true] %s197_s7 }
  0x36   : > { %s1190_s10 = scalar_lea.hbm %s1402_s1, %s820_s26  ;;  %p933_p3 = pneg %p1183_p11 }
  0x37   : > { %s931_s18 = scalar_lea.hbm %s1190_s10, 12288  ;;  %s936_s30 = scalar_lea.hbm %s1402_s1, 24576 }
  0x38   : > { %p932_p0 = scmp.ne.s32.totalorder %s1190_s10, %s931_s18  ;;  %p937_p9 = scmp.lt.u32.totalorder %s1190_s10, %s1402_s1 }
  0x39   : > { %p938_p1 = scmp.lt.u32.totalorder %s936_s30, %s931_s18  ;;  %p940_p4 = scmp.lt.u32.totalorder %s931_s18, %s1190_s10 }
  0x3a   : > { %p934_p5 = pnand %p933_p3, %p932_p0 }
  0x3b   : > { %p939_p2 = por %p938_p1, %p937_p9 }
  0x3c   : > { %p935_p7 = pneg %p934_p5 }
  0x3d   : > { %p941_p6 = por %p940_p4, %p939_p2 }
  0x3f   : > { %p942_p8 = pnand %p941_p6, %p935_p7 }
  0x41   : > { %945 = shalt.err (!%p942_p8)
}
  0x42   : > { %s946_s27 = scalar_lea.vmem %s1192_s7, 12288  ;;  %s1052_s6 = smov [#allocation6]  }
  0x43   : > { %p947_p12 = scmp.ne.s32.totalorder %s1192_s7, %s946_s27  ;;  %s951_s9 = sshll.u32 %s1052_s6, 4  ;;  %s952_s9 = int_to_ptr.vmem [resolvable:$false] %s951_s9 }
  0x44   : > { %s953_s21 = scalar_lea.vmem %s952_s9, 24576  ;;  %p954_p5 = scmp.lt.s32.totalorder %s1192_s7, %s952_s9 }
  0x45   : > { %p949_p13 = pnand %p947_p12, %p933_p3  ;;  %p955_p9 = scmp.lt.s32.totalorder %s953_s21, %s946_s27 }
  0x47   : > { %p950_p0 = pneg %p949_p13  ;;  %p956_p1 = por %p955_p9, %p954_p5 }
  0x49   : > { %p957_p2 = pnand %p956_p1, %p950_p0 }
  0x4b   : > { %960 = shalt.err (!%p957_p2)
}
  0x4c   : > { %s1053_s18 = smov 512   ;;  %s1054_s19 = smov 32  }
  0x4d   : > { %837 = dma.hbm_to_vmem [thread:$0]  (!%p1183_p11), %s1190_s10, 12288, %s1192_s7, %s1194_s11, %s1053_s18, %s1053_s18, %s1054_s19  }
  0x4e   : > { %p1418_p3 = scmp.ne.s32.totalorder %s1413_s24, 0 }
  0x4f   : > { %p1419_p7 = scmp.ne.s32.totalorder (!%p1418_p3), %s1409_s20, 0 }
  0x50   : > { %209 = sbr.rel (%p1418_p3) target bundleno = 380 (0x17c), region = 32 }
  0x57   : > { %1014 = dma.done.wait (%p1419_p7), [#allocation4], 512  }
  0x58   : > { %1016 = vsyncadd (%p1419_p7), [#allocation4], 4294966784  ;;  %s1229_s25 = sand.u32 1, %s1031_s13   ;;  %p1420_p11 = scmp.ne.s32.totalorder %s1411_s22, 0 }
  0x59   : > { %s821_s30 = smul.u32 768, %s1229_s25  ;;  %s216_s4 = scalar_lea.sflag [#allocation7], %s1229_s25 }
  0x5b   : > { %s1233_s26 = scalar_lea.vmem [#allocation6], %s821_s30 }
  0x5c   : > { %1018 = dma.done.wait (%p1420_p11), %s216_s4, 12288  }
  0x5d   : > { %1020 = vsyncadd (%p1420_p11), %s216_s4, 4294955008  ;;  %v1055_v0 = vmov 0   ;;  %v271_v1 = vld [vmem:[%s1233_s26 + $0x8] sm:$0xff]  ;;  %v273_v3 = vld [vmem:[%s1233_s26 + $0x18] sm:$0xff]  ;;  %vm366_vm0 = vcmask 523264   ;;  %s712_s8 = sshll.u32 %s1229_s25, 6 }
  0x5e   : > { %902 = vset.pattern.permute.xlu0 %v1055_v0  ;;  %v275_v2 = vld [vmem:[%s1233_s26 + $0x28] sm:$0xff]  ;;  %v277_v5 = vld [vmem:[%s1233_s26 + $0x38] sm:$0xff]  ;;  %v270_v6 = vld [vmem:[%s1233_s26] sm:$0xff]  ;;  %s241_s10 = scalar_lea.vmem [#allocation8], %s712_s8  ;;  %s722_s27 = sshll.u32 %s1039_s15, 10 }
  0x5f   : > { %v723_v4 = vpack.c.bf16 %v275_v2, %v271_v1  ;;  %v274_v7 = vld [vmem:[%s1233_s26 + $0x20] sm:$0xff]  ;;  %v771_v8 = vpack.c.bf16 %v277_v5, %v273_v3  ;;  %v272_v10 = vld [vmem:[%s1233_s26 + $0x10] sm:$0xff]  ;;  %v279_v12 = vld [vmem:[%s1233_s26 + $0x48] sm:$0xff]  ;;  %s598_s11 = sshll.u32 %s241_s10, 4  ;;  %s1352_s15 = scalar_lea.hbm %s1404_s3, %s722_s27  ;;  %s1347_s11 = int_to_ptr.vmem [resolvable:$true] %s598_s11 }
  0x60   : > { %v725_v9 = vpack.c.bf16 %v274_v7, %v270_v6  ;;  %v276_v11 = vld [vmem:[%s1233_s26 + $0x30] sm:$0xff]  ;;  %v283_v14 = vld [vmem:[%s1233_s26 + $0x68] sm:$0xff]  ;;  %v281_v15 = vld [vmem:[%s1233_s26 + $0x58] sm:$0xff]  ;;  %s583_s21 = scalar_lea.sflag [#allocation5], %s1229_s25  ;;  %s961_s18 = scalar_lea.vmem %s1347_s11, 1024 }
  0x61   : > { %724 = vmatprep.subr.bf16.mxu0 %v723_v4  ;;  %v773_v13 = vpack.c.bf16 %v276_v11, %v272_v10  ;;  %v285_v16 = vld [vmem:[%s1233_s26 + $0x78] sm:$0xff]  ;;  %772 = vmatprep.subr.bf16.mxu1 %v771_v8  ;;  %v727_v17 = vpack.c.bf16 %v283_v14, %v279_v12  ;;  %v278_v19 = vld [vmem:[%s1233_s26 + $0x40] sm:$0xff]  ;;  %v280_v21 = vld [vmem:[%s1233_s26 + $0x50] sm:$0xff]  ;;  %p962_p4 = scmp.ne.s32.totalorder %s1347_s11, %s961_s18  ;;  %s1056_s19 = smov [#allocation8]  }
  0x62   : > { %726 = vmatpush1.bf16.msra.mxu0 %v725_v9  ;;  %v775_v18 = vpack.c.bf16 %v285_v16, %v281_v15  ;;  %v282_v20 = vld [vmem:[%s1233_s26 + $0x60] sm:$0xff]  ;;  %v284_v23 = vld [vmem:[%s1233_s26 + $0x70] sm:$0xff]  ;;  %v287_v24 = vld [vmem:[%s1233_s26 + $0x88] sm:$0xff]  ;;  %s965_s30 = sshll.u32 %s1056_s19, 4  ;;  %s966_s30 = int_to_ptr.vmem [resolvable:$false] %s965_s30 }
  0x63   : > { %774 = vmatpush1.bf16.msra.mxu1 %v773_v13  ;;  %v729_v22 = vpack.c.bf16 %v282_v20, %v278_v19  ;;  %v291_v25 = vld [vmem:[%s1233_s26 + $0xa8] sm:$0xff]  ;;  %728 = vmatprep.subr.bf16.mxu0 %v727_v17  ;;  %v777_v26 = vpack.c.bf16 %v284_v23, %v280_v21  ;;  %v289_v28 = vld [vmem:[%s1233_s26 + $0x98] sm:$0xff]  ;;  %v286_v30 = vld [vmem:[%s1233_s26 + $0x80] sm:$0xff]  ;;  %p963_p6 = pnand %p962_p4, %p1171_p10  ;;  %s967_s4 = scalar_lea.vmem %s966_s30, 2048 }
  0x64   : > { %776 = vmatprep.subr.bf16.mxu1 %v775_v18  ;;  %v731_v27 = vpack.c.bf16 %v291_v25, %v287_v24  ;;  %v293_v29 = vld [vmem:[%s1233_s26 + $0xb8] sm:$0xff]  ;;  %v290_v32 = vld [vmem:[%s1233_s26 + $0xa0] sm:$0xff]  ;;  %v288_v33 = vld [vmem:[%s1233_s26 + $0x90] sm:$0xff]  ;;  %p968_p12 = scmp.lt.s32.totalorder %s1347_s11, %s966_s30  ;;  %p969_p13 = scmp.lt.s32.totalorder %s967_s4, %s961_s18 }
  0x65   : > { %v779_v31 = vpack.c.bf16 %v293_v29, %v289_v28  ;;  %v292_v34 = vld [vmem:[%s1233_s26 + $0xb0] sm:$0xff]  ;;  %v733_v35 = vpack.c.bf16 %v290_v32, %v286_v30  ;;  %v295_v36 = vld [vmem:[%s1233_s26 + $0xc8] sm:$0xff]  ;;  %v297_v38 = vld [vmem:[%s1233_s26 + $0xd8] sm:$0xff]  ;;  %p964_p8 = pneg %p963_p6 }
  0x66   : > { %730 = vmatpush1.bf16.msra.mxu0 %v729_v22  ;;  %v299_v37 = vld [vmem:[%s1233_s26 + $0xe8] sm:$0xff]  ;;  %v781_v39 = vpack.c.bf16 %v292_v34, %v288_v33  ;;  %v301_v41 = vld [vmem:[%s1233_s26 + $0xf8] sm:$0xff]  ;;  %v294_v42 = vld [vmem:[%s1233_s26 + $0xc0] sm:$0xff]  ;;  %p970_p0 = por %p969_p13, %p968_p12 }
  0x67   : > { %778 = vmatpush1.bf16.msra.mxu1 %v777_v26  ;;  %732 = vmatprep.subr.bf16.mxu0 %v731_v27  ;;  %v735_v40 = vpack.c.bf16 %v299_v37, %v295_v36  ;;  %v298_v43 = vld [vmem:[%s1233_s26 + $0xe0] sm:$0xff]  ;;  %v783_v44 = vpack.c.bf16 %v301_v41, %v297_v38  ;;  %v296_v45 = vld [vmem:[%s1233_s26 + $0xd0] sm:$0xff]  ;;  %v303_v47 = vld [vmem:[%s1233_s26 + $0x108] sm:$0xff] }
  0x68   : > { %780 = vmatprep.subr.bf16.mxu1 %v779_v31  ;;  %v300_v46 = vld [vmem:[%s1233_s26 + $0xf0] sm:$0xff]  ;;  %v307_v48 = vld [vmem:[%s1233_s26 + $0x128] sm:$0xff]  ;;  %v305_v49 = vld [vmem:[%s1233_s26 + $0x118] sm:$0xff]  ;;  %v737_v51 = vpack.c.bf16 %v298_v43, %v294_v42  ;;  %p971_p5 = pnand %p970_p0, %p964_p8 }
  0x69   : > { %v309_v50 = vld [vmem:[%s1233_s26 + $0x138] sm:$0xff]  ;;  %v785_v52 = vpack.c.bf16 %v300_v46, %v296_v45  ;;  %v739_v53 = vpack.c.bf16 %v307_v48, %v303_v47  ;;  %v302_v54 = vld [vmem:[%s1233_s26 + $0x100] sm:$0xff]  ;;  %v304_v56 = vld [vmem:[%s1233_s26 + $0x110] sm:$0xff] }
  0x6a   : > { %734 = vmatpush1.bf16.msra.mxu0 %v733_v35  ;;  %v306_v55 = vld [vmem:[%s1233_s26 + $0x120] sm:$0xff]  ;;  %v787_v57 = vpack.c.bf16 %v309_v50, %v305_v49  ;;  %v308_v58 = vld [vmem:[%s1233_s26 + $0x130] sm:$0xff]  ;;  %v311_v59 = vld [vmem:[%s1233_s26 + $0x148] sm:$0xff] }
  0x6b   : > { %782 = vmatpush1.bf16.msra.mxu1 %v781_v39  ;;  %736 = vmatprep.subr.bf16.mxu0 %v735_v40  ;;  %v315_v60 = vld [vmem:[%s1233_s26 + $0x168] sm:$0xff]  ;;  %v313_v61 = vld [vmem:[%s1233_s26 + $0x158] sm:$0xff]  ;;  %v741_v63 = vpack.c.bf16 %v306_v55, %v302_v54  ;;  %v789_v0 = vpack.c.bf16 %v308_v58, %v304_v56  ;;  %v310_v2 = vld [vmem:[%s1233_s26 + $0x140] sm:$0xff] }
  0x6c   : > { %784 = vmatprep.subr.bf16.mxu1 %v783_v44  ;;  %v317_v62 = vld [vmem:[%s1233_s26 + $0x178] sm:$0xff]  ;;  %v743_v1 = vpack.c.bf16 %v315_v60, %v311_v59  ;;  %v314_v3 = vld [vmem:[%s1233_s26 + $0x160] sm:$0xff]  ;;  %v312_v4 = vld [vmem:[%s1233_s26 + $0x150] sm:$0xff] }
  0x6d   : > { %v791_v5 = vpack.c.bf16 %v317_v62, %v313_v61  ;;  %v316_v6 = vld [vmem:[%s1233_s26 + $0x170] sm:$0xff]  ;;  %v319_v7 = vld [vmem:[%s1233_s26 + $0x188] sm:$0xff]  ;;  %v321_v9 = vld [vmem:[%s1233_s26 + $0x198] sm:$0xff]  ;;  %v745_v11 = vpack.c.bf16 %v314_v3, %v310_v2 }
  0x6e   : > { %738 = vmatpush1.bf16.msra.mxu0 %v737_v51  ;;  %v323_v8 = vld [vmem:[%s1233_s26 + $0x1a8] sm:$0xff]  ;;  %v325_v10 = vld [vmem:[%s1233_s26 + $0x1b8] sm:$0xff]  ;;  %v793_v12 = vpack.c.bf16 %v316_v6, %v312_v4  ;;  %v318_v14 = vld [vmem:[%s1233_s26 + $0x180] sm:$0xff] }
  0x6f   : > { %786 = vmatpush1.bf16.msra.mxu1 %v785_v52  ;;  %740 = vmatprep.subr.bf16.mxu0 %v739_v53  ;;  %v747_v13 = vpack.c.bf16 %v323_v8, %v319_v7  ;;  %v322_v15 = vld [vmem:[%s1233_s26 + $0x1a0] sm:$0xff]  ;;  %v320_v16 = vld [vmem:[%s1233_s26 + $0x190] sm:$0xff]  ;;  %v795_v17 = vpack.c.bf16 %v325_v10, %v321_v9  ;;  %v327_v19 = vld [vmem:[%s1233_s26 + $0x1c8] sm:$0xff] }
  0x70   : > { %788 = vmatprep.subr.bf16.mxu1 %v787_v57  ;;  %v324_v18 = vld [vmem:[%s1233_s26 + $0x1b0] sm:$0xff]  ;;  %v331_v20 = vld [vmem:[%s1233_s26 + $0x1e8] sm:$0xff]  ;;  %v329_v21 = vld [vmem:[%s1233_s26 + $0x1d8] sm:$0xff]  ;;  %v749_v23 = vpack.c.bf16 %v322_v15, %v318_v14 }
  0x71   : > { %v333_v22 = vld [vmem:[%s1233_s26 + $0x1f8] sm:$0xff]  ;;  %v797_v24 = vpack.c.bf16 %v324_v18, %v320_v16  ;;  %v751_v25 = vpack.c.bf16 %v331_v20, %v327_v19  ;;  %v326_v26 = vld [vmem:[%s1233_s26 + $0x1c0] sm:$0xff]  ;;  %v328_v28 = vld [vmem:[%s1233_s26 + $0x1d0] sm:$0xff] }
  0x72   : > { %742 = vmatpush1.bf16.msra.mxu0 %v741_v63  ;;  %v330_v27 = vld [vmem:[%s1233_s26 + $0x1e0] sm:$0xff]  ;;  %v799_v29 = vpack.c.bf16 %v333_v22, %v329_v21  ;;  %v332_v30 = vld [vmem:[%s1233_s26 + $0x1f0] sm:$0xff]  ;;  %v335_v31 = vld [vmem:[%s1233_s26 + $0x208] sm:$0xff] }
  0x73   : > { %790 = vmatpush1.bf16.msra.mxu1 %v789_v0  ;;  %744 = vmatprep.subr.bf16.mxu0 %v743_v1  ;;  %v339_v32 = vld [vmem:[%s1233_s26 + $0x228] sm:$0xff]  ;;  %v337_v33 = vld [vmem:[%s1233_s26 + $0x218] sm:$0xff]  ;;  %v753_v35 = vpack.c.bf16 %v330_v27, %v326_v26  ;;  %v801_v36 = vpack.c.bf16 %v332_v30, %v328_v28  ;;  %v334_v38 = vld [vmem:[%s1233_s26 + $0x200] sm:$0xff] }
  0x74   : > { %792 = vmatprep.subr.bf16.mxu1 %v791_v5  ;;  %v341_v34 = vld [vmem:[%s1233_s26 + $0x238] sm:$0xff]  ;;  %v755_v37 = vpack.c.bf16 %v339_v32, %v335_v31  ;;  %v338_v39 = vld [vmem:[%s1233_s26 + $0x220] sm:$0xff]  ;;  %v336_v40 = vld [vmem:[%s1233_s26 + $0x210] sm:$0xff] }
  0x75   : > { %v803_v41 = vpack.c.bf16 %v341_v34, %v337_v33  ;;  %v340_v42 = vld [vmem:[%s1233_s26 + $0x230] sm:$0xff]  ;;  %v343_v43 = vld [vmem:[%s1233_s26 + $0x248] sm:$0xff]  ;;  %v345_v45 = vld [vmem:[%s1233_s26 + $0x258] sm:$0xff]  ;;  %v757_v47 = vpack.c.bf16 %v338_v39, %v334_v38 }
  0x76   : > { %746 = vmatpush1.bf16.msra.mxu0 %v745_v11  ;;  %v347_v44 = vld [vmem:[%s1233_s26 + $0x268] sm:$0xff]  ;;  %v349_v46 = vld [vmem:[%s1233_s26 + $0x278] sm:$0xff]  ;;  %v342_v48 = vld [vmem:[%s1233_s26 + $0x240] sm:$0xff]  ;;  %v805_v50 = vpack.c.bf16 %v340_v42, %v336_v40 }
  0x77   : > { %794 = vmatpush1.bf16.msra.mxu1 %v793_v12  ;;  %748 = vmatprep.subr.bf16.mxu0 %v747_v13  ;;  %v267_v49 = vld [vmem:[#allocation3 + $0x8] sm:$0xff]  ;;  %v759_v51 = vpack.c.bf16 %v347_v44, %v343_v43  ;;  %v346_v52 = vld [vmem:[%s1233_s26 + $0x260] sm:$0xff]  ;;  %v344_v53 = vld [vmem:[%s1233_s26 + $0x250] sm:$0xff]  ;;  %v807_v55 = vpack.c.bf16 %v349_v46, %v345_v45 }
  0x78   : > { %796 = vmatprep.subr.bf16.mxu1 %v795_v17  ;;  %v554_v54 = vld [vmem:[%s1403_s2] sm:$0xff]  ;;  %v348_v56 = vld [vmem:[%s1233_s26 + $0x270] sm:$0xff]  ;;  %v351_v57 = vld [vmem:[%s1233_s26 + $0x288] sm:$0xff]  ;;  %713 = vmatprep.mubr.msk.f32.mxu0 %vm366_vm0, %v267_v49  ;;  %v761_v61 = vpack.c.bf16 %v346_v52, %v342_v48 }
  0x79   : > { %v355_v58 = vld [vmem:[%s1233_s26 + $0x2a8] sm:$0xff]  ;;  %v353_v59 = vld [vmem:[%s1233_s26 + $0x298] sm:$0xff]  ;;  %715 = vmatprep.mubr.msk.f32.mxu1 %vm366_vm0, %v267_v49  ;;  %558 = vperm.xlu0 %902, %v554_v54   ;;  %v809_v63 = vpack.c.bf16 %v348_v56, %v344_v53  ;;  %v350_v1 = vld [vmem:[%s1233_s26 + $0x280] sm:$0xff] }
  0x7a   : > { %750 = vmatpush1.bf16.msra.mxu0 %v749_v23  ;;  %v357_v60 = vld [vmem:[%s1233_s26 + $0x2b8] sm:$0xff]  ;;  %v555_v62 = vld [vmem:[%s1403_s2 + $0x8] sm:$0xff]  ;;  %v763_v0 = vpack.c.bf16 %v355_v58, %v351_v57  ;;  %v354_v2 = vld [vmem:[%s1233_s26 + $0x2a0] sm:$0xff] }
  0x7b   : > { %798 = vmatpush1.bf16.msra.mxu1 %v797_v24  ;;  %752 = vmatprep.subr.bf16.mxu0 %v751_v25  ;;  %v352_v3 = vld [vmem:[%s1233_s26 + $0x290] sm:$0xff]  ;;  %v811_v4 = vpack.c.bf16 %v357_v60, %v353_v59  ;;  %v359_v6 = vld [vmem:[%s1233_s26 + $0x2c8] sm:$0xff]  ;;  %v361_v8 = vld [vmem:[%s1233_s26 + $0x2d8] sm:$0xff]  ;;  %v765_v10 = vpack.c.bf16 %v354_v2, %v350_v1 }
  0x7c   : > { %800 = vmatprep.subr.bf16.mxu1 %v799_v29  ;;  %v356_v5 = vld [vmem:[%s1233_s26 + $0x2b0] sm:$0xff]  ;;  %v363_v7 = vld [vmem:[%s1233_s26 + $0x2e8] sm:$0xff]  ;;  %v365_v9 = vld [vmem:[%s1233_s26 + $0x2f8] sm:$0xff] }
  0x7d   : > { %563 = vperm.xlu0 %902, %v555_v62   ;;  %v813_v11 = vpack.c.bf16 %v356_v5, %v352_v3  ;;  %v767_v12 = vpack.c.bf16 %v363_v7, %v359_v6  ;;  %v358_v13 = vld [vmem:[%s1233_s26 + $0x2c0] sm:$0xff]  ;;  %v815_v15 = vpack.c.bf16 %v365_v9, %v361_v8  ;;  %v360_v16 = vld [vmem:[%s1233_s26 + $0x2d0] sm:$0xff]  ;;  %v269_v21 = vld [vmem:[#allocation3 + $0x18] sm:$0xff] }
  0x7e   : > { %754 = vmatpush1.bf16.msra.mxu0 %v753_v35  ;;  %v362_v14 = vld [vmem:[%s1233_s26 + $0x2e0] sm:$0xff]  ;;  %v364_v17 = vld [vmem:[%s1233_s26 + $0x2f0] sm:$0xff] }
  0x7f   : > { %802 = vmatpush1.bf16.msra.mxu1 %v801_v36  ;;  %756 = vmatprep.subr.bf16.mxu0 %v755_v37  ;;  %v769_v18 = vpack.c.bf16 %v362_v14, %v358_v13  ;;  %v817_v19 = vpack.c.bf16 %v364_v17, %v360_v16  ;;  %v266_v20 = vld [vmem:[#allocation3] sm:$0xff]  ;;  %v268_v22 = vld [vmem:[#allocation3 + $0x10] sm:$0xff] }
  0x80   : > { %804 = vmatprep.subr.bf16.mxu1 %v803_v41 }
  0x82   : > { %758 = vmatpush1.bf16.msra.mxu0 %v757_v47 }
  0x83   : > { %806 = vmatpush1.bf16.msra.mxu1 %v805_v50  ;;  %760 = vmatprep.subr.bf16.mxu0 %v759_v51 }
  0x84   : > { %808 = vmatprep.subr.bf16.mxu1 %v807_v55 }
  0x86   : > { %762 = vmatpush1.bf16.msra.mxu0 %v761_v61 }
  0x87   : > { %810 = vmatpush1.bf16.msra.mxu1 %v809_v63  ;;  %764 = vmatprep.subr.bf16.mxu0 %v763_v0 }
  0x88   : > { %812 = vmatprep.subr.bf16.mxu1 %v811_v4 }
  0x8a   : > { %766 = vmatpush1.bf16.msra.mxu0 %v765_v10 }
  0x8b   : > { %814 = vmatpush1.bf16.msra.mxu1 %v813_v11  ;;  %768 = vmatprep.subr.bf16.mxu0 %v767_v12 }
  0x8c   : > { %816 = vmatprep.subr.bf16.mxu1 %v815_v15 }
  0x8e   : > { %770 = vmatpush1.bf16.msra.mxu0 %v769_v18 }
  0x8f   : > { %818 = vmatpush1.bf16.msra.mxu1 %v817_v19 }
  0x91   : > { %438 = vmatmul.mubr.f32.vlgmr.msra.gmra.mrb[0].mxu0 %v266_v20 }
  0x92   : > { %515 = vmatmul.mubr.f32.vlgmr.msra.gmra.mrb[0].mxu1 %v266_v20  ;;  %714 = vmatprep.mubr.msk.f32.mxu0 %vm366_vm0, %v269_v21 }
  0x93   : > { %716 = vmatprep.mubr.msk.f32.mxu1 %vm366_vm0, %v269_v21 }
  0x95   : > { %444 = vmatmul.mubr.f32.gmra.mrb[2].mxu0 %v268_v22 }
  0x96   : > { %521 = vmatmul.mubr.f32.gmra.mrb[2].mxu1 %v268_v22 }
  0xf8   : > { %v559_v23 = vpop.permute.xlu0 %558 }
  0xfc   : > { %v564_v32 = vpop.permute.xlu0 %563 }
 0x164   : > { %v439_v24 = vpop.f32.mrb[0].mxu0 }
 0x165   : > { %v566_v25 = vadd.f32 %v559_v23, %v439_v24  ;;  %v516_v26 = vpop.f32.mrb[0].mxu1  ;;  %v441_v27 = vpop.f32.mrb[1].mxu0 }
 0x166   : > { %v568_v28 = vadd.f32 %v559_v23, %v516_v26  ;;  %v567_v29 = vadd.f32 %v559_v23, %v441_v27  ;;  %v518_v30 = vpop.f32.mrb[1].mxu1 }
 0x167   : > { %574 = vst [vmem:[%s241_s10] sm:$0xff] %v566_v25  ;;  %v569_v31 = vadd.f32 %v559_v23, %v518_v30 }
 0x168   : > { %576 = vst [vmem:[%s241_s10 + $0x10] sm:$0xff] %v568_v28  ;;  %575 = vst [vmem:[%s241_s10 + $0x8] sm:$0xff] %v567_v29  ;;  %v445_v33 = vpop.f32.mrb[2].mxu0 }
 0x169   : > { %577 = vst [vmem:[%s241_s10 + $0x18] sm:$0xff] %v569_v31  ;;  %v570_v34 = vadd.f32 %v564_v32, %v445_v33  ;;  %v522_v35 = vpop.f32.mrb[2].mxu1  ;;  %v447_v36 = vpop.f32.mrb[3].mxu0 }
 0x16a   : > { %v572_v37 = vadd.f32 %v564_v32, %v522_v35  ;;  %v571_v38 = vadd.f32 %v564_v32, %v447_v36  ;;  %v524_v39 = vpop.f32.mrb[3].mxu1 }
 0x16b   : > { %578 = vst [vmem:[%s241_s10 + $0x20] sm:$0xff] %v570_v34  ;;  %v573_v40 = vadd.f32 %v564_v32, %v524_v39 }
 0x16c   : > { %580 = vst [vmem:[%s241_s10 + $0x30] sm:$0xff] %v572_v37  ;;  %579 = vst [vmem:[%s241_s10 + $0x28] sm:$0xff] %v571_v38 }
 0x16d   : > { %581 = vst [vmem:[%s241_s10 + $0x38] sm:$0xff] %v573_v40 }
 0x16e   : > { %974 = shalt.err (!%p971_p5)
}
 0x16f   : > { %s975_s26 = scalar_lea.hbm %s1352_s15, 1024  ;;  %s979_s24 = scalar_lea.hbm %s1404_s3, 2048 }
 0x170   : > { %p976_p9 = scmp.ne.s32.totalorder %s1352_s15, %s975_s26  ;;  %p980_p3 = scmp.lt.u32.totalorder %s1352_s15, %s1404_s3 }
 0x171   : > { %p981_p7 = scmp.lt.u32.totalorder %s979_s24, %s975_s26  ;;  %p983_p4 = scmp.lt.u32.totalorder %s975_s26, %s1352_s15 }
 0x172   : > { %p977_p1 = pnand %p976_p9, %p1171_p10 }
 0x173   : > { %p982_p11 = por %p981_p7, %p980_p3 }
 0x174   : > { %p978_p2 = pneg %p977_p1 }
 0x175   : > { %p984_p6 = por %p983_p4, %p982_p11 }
 0x177   : > { %p985_p8 = pnand %p984_p6, %p978_p2 }
 0x179   : > { %988 = shalt.err (!%p985_p8)
}
 0x17a   : > { %s1057_s10 = smov 512   ;;  %s1058_s27 = smov 32  }
 0x17b   : > { %828 = dma.vmem_to_hbm [thread:$0]  (%p1171_p10), %s1347_s11, 1024, %s1352_s15, %s583_s21, %s1057_s10, %s1057_s10, %s1058_s27  }
 0x17c PF: > { %s613_s6 = sand.u32 1, %s1027_s12   ;;  %p1421_p12 = scmp.ne.s32.totalorder %s1412_s23, 0 }
 0x17d   : > { %p1422_p13 = scmp.ge.s32.totalorder %s1047_s17, 2  ;;  %s614_s9 = scalar_lea.sflag [#allocation5], %s613_s6 }
 0x17f   : > { %p839_p0 = pnand %p1422_p13, %p1421_p12 }
 0x181   : > { %1022 = dma.done.wait (!%p839_p0), %s614_s9, 1024  }
 0x182   : > { %1024 = vsyncadd (!%p839_p0), %s614_s9, 4294966272  ;;  %s20_s17 = sadd.s32 1, %s1047_s17   ;;  %s1423_s12 = smov %s1031_s13 }
 0x183   : > { %p17_p5 = scmp.ge.s32.totalorder %s20_s17, 4   ;;  %s1424_s13 = smov %s1035_s14 }
 0x184   : > { %s1425_s14 = smov %s1180_s5  ;;  %s1426_s15 = smov %s1043_s16 }
 0x185   : > { %s1427_s16 = smov %s1429_s28  ;;  %19 = sbr.rel (!%p17_p5) target bundleno = 7 (0x7), region = 91 }
 0x18c   :  { %619 = vsyncpa [#allocation4], 1 }
 0x18d   :  { %621 = vsyncpa [#allocation4 + $0x1], 1 }
 0x18e   :  { %622 = vsyncpa [#allocation7], 1 }
 0x18f   :  { %624 = vsyncpa [#allocation7 + $0x1], 1 }
 0x190   :  { %625 = vsyncpa [#allocation5], 1 }
 0x191   :  { %627 = vsyncpa [#allocation5 + $0x1], 1 }

</bundles_post_ra>
